<compile_context>
chip_gen: v5e
topology: v5e:2x2
jax: 0.10.0
libtpu: 0.0.40
codegen_flags: <defaults>
</compile_context>

<pallas_src>
import functools

import jax
import jax.numpy as jnp
from jax import lax
from jax.experimental import pallas as pl
from jax.experimental.pallas import tpu as pltpu


def _round_up(n, m):
    return ((n + m - 1) // m) * m


# ---------------------------------------------------------------------------
# Kernels
# ---------------------------------------------------------------------------

def _proj_kernel_single_k(x_ref, w_ref, b_ref, o_ref):
    """One K step: no scratch, no RMW -- write the output tile directly."""
    acc = jnp.dot(x_ref[...], w_ref[...], preferred_element_type=jnp.float32)
    o_ref[...] = (acc + b_ref[...].astype(jnp.float32)).astype(o_ref.dtype)


def _proj_kernel_multi_k(x_ref, w_ref, b_ref, o_ref, acc_ref, *, d_model, tk):
    """K-tiled reduction with f32 VMEM accumulator carried across the K axis."""
    k = pl.program_id(2)

    x = x_ref[...]
    w = w_ref[...]
    if d_model % tk != 0:
        # The last K block is clipped; zero OOB columns/rows so unspecified
        # data (possibly NaN bit patterns) never reaches the accumulator.
        # Static `if`: zero cost when tk divides d_model.
        valid = d_model - k * tk  # >= tk on every block except the last
        col = lax.broadcasted_iota(jnp.int32, x.shape, 1)
        x = jnp.where(col < valid, x, jnp.zeros_like(x))
        row = lax.broadcasted_iota(jnp.int32, w.shape, 0)
        w = jnp.where(row < valid, w, jnp.zeros_like(w))

    partial = jnp.dot(x, w, preferred_element_type=jnp.float32)

    @pl.when(k == 0)
    def _assign():
        acc_ref[...] = partial

    @pl.when(k > 0)
    def _accumulate():
        acc_ref[...] += partial

    @pl.when(k == pl.num_programs(2) - 1)
    def _finalize():
        o_ref[...] = (acc_ref[...] + b_ref[...].astype(jnp.float32)).astype(o_ref.dtype)


# ---------------------------------------------------------------------------
# Tile selection
# ---------------------------------------------------------------------------

def _vmem_budget_bytes():
    """Conservative double-buffered working-set budget.

    12 MiB fits every generation's scoped-VMEM default (v5e 16 MiB, v6e/v7x
    32 MiB) without raising vmem_limit_bytes; a best-effort hardware query
    tightens it further on chips with less physical VMEM (v7x: 64 MiB/TC).
    """
    budget = 12 * 1024 * 1024
    try:
        info = pltpu.get_tpu_info()
        cap = getattr(info, "vmem_capacity_bytes", None)
        if cap:
            budget = min(budget, cap // 4)
    except Exception:
        pass
    return budget


def _select_tiles(M, d_proj, d_model, in_bytes, out_bytes, tm, tn, tk_max):
    tm_eff = _round_up(min(tm, _round_up(M, 8)), 8)
    tn_eff = _round_up(min(tn, _round_up(d_proj, 128)), 128)

    # K tile: full K when it fits, otherwise the largest 128-multiple <= tk_max.
    # No "must divide d_model" requirement -- the tail block is masked in-kernel.
    if d_model <= tk_max:
        tk_eff = d_model
    else:
        tk_eff = max(128, (tk_max // 128) * 128)

    # Small problems: make sure the parallel (i, j) grid has >= 2 blocks so
    # both TensorCores on v7x (megacore on v6e) get work.
    if pl.cdiv(M, tm_eff) * pl.cdiv(d_proj, tn_eff) < 2:
        if tn_eff > 128 and d_proj > 128:
            tn_eff = 128
        elif tm_eff > 8 and M > 8:
            tm_eff = _round_up(max(8, tm_eff // 2), 8)

    budget = _vmem_budget_bytes()

    def working_set(tm_e, tn_e, tk_e):
        xs = tm_e * tk_e * in_bytes * 2        # x tile, double-buffered
        ws = tk_e * tn_e * in_bytes * 2        # W tile, double-buffered
        bs = tn_e * 4 * 2                      # bias tile
        os = tm_e * tn_e * out_bytes * 2       # output tile
        acc = tm_e * tn_e * 4                  # f32 scratch (multi-K only)
        return xs + ws + bs + os + acc

    # Shrink tiles (tk first, then tm, then tn) until the working set fits.
    while working_set(tm_eff, tn_eff, tk_eff) > budget:
        if tk_eff > 512:
            tk_eff = _round_up(tk_eff // 2, 128)
        elif tm_eff > 128:
            tm_eff = _round_up(tm_eff // 2, 8)
        elif tn_eff > 128:
            tn_eff = 128
        else:
            break

    return tm_eff, tn_eff, tk_eff


# ---------------------------------------------------------------------------
# Wrapper
# ---------------------------------------------------------------------------

def prepare_weight(weight_nk):
    """One-time (param-load-time) transpose of the nn.Linear weight.

    nn.Linear stores W as (d_proj, d_model); the kernel consumes (d_model,
    d_proj) so the MXU contraction is natural [M,K]@[K,N].  Do this once and
    cache the result -- it is NOT part of the per-call hot path.
    """
    return jnp.asarray(weight_nk).T


def projection(x, weight_kn, bias, *, tm=512, tn=256, tk_max=1024):
    """Linear projection x @ W + b.

    x:         (..., d_model)
    weight_kn: (d_model, d_proj)   -- see prepare_weight()
    bias:      (d_proj,)
    """
    *lead, d_model = x.shape
    dk, d_proj = weight_kn.shape
    assert dk == d_model, "weight first dim must equal d_model"
    assert bias.shape == (d_proj,)

    M = 1
    for d in lead:
        M *= d

    x2d = x.reshape(M, d_model)
    b2d = bias.reshape(1, d_proj)

    in_bytes = max(jnp.dtype(x.dtype).itemsize, jnp.dtype(weight_kn.dtype).itemsize)
    out_bytes = jnp.dtype(x.dtype).itemsize
    tm_eff, tn_eff, tk_eff = _select_tiles(
        M, d_proj, d_model, in_bytes, out_bytes, tm, tn, tk_max)

    nk = pl.cdiv(d_model, tk_eff)
    grid = (pl.cdiv(M, tm_eff), pl.cdiv(d_proj, tn_eff), nk)

    if nk == 1:
        kernel = _proj_kernel_single_k
        scratch = []
    else:
        kernel = functools.partial(_proj_kernel_multi_k, d_model=d_model, tk=tk_eff)
        scratch = [pltpu.VMEM((tm_eff, tn_eff), jnp.float32)]

    out = pl.pallas_call(
        kernel,
        out_shape=jax.ShapeDtypeStruct((M, d_proj), x.dtype),
        grid_spec=pltpu.PrefetchScalarGridSpec(
            num_scalar_prefetch=0,
            grid=grid,
            in_specs=[
                pl.BlockSpec((tm_eff, tk_eff), lambda i, j, k: (i, k)),  # x tile
                pl.BlockSpec((tk_eff, tn_eff), lambda i, j, k: (k, j)),  # W tile [K,N]
                pl.BlockSpec((1, tn_eff), lambda i, j, k: (0, j)),       # bias slice
            ],
            out_specs=pl.BlockSpec((tm_eff, tn_eff), lambda i, j, k: (i, j)),
            scratch_shapes=scratch,
        ),
        compiler_params=pltpu.CompilerParams(
            # M/N shard across TensorCores; K carries the accumulator so it
            # stays "arbitrary" and innermost.
            dimension_semantics=("parallel", "parallel", "arbitrary"),
        ),
    )(x2d, weight_kn, b2d)

    return out.reshape(*lead, d_proj)


# ---------------------------------------------------------------------------
# Demo / correctness check
# ---------------------------------------------------------------------------

if __name__ == "__main__":
    B, S = 2, 8
    d_model, d_proj = 768, 256

    key = jax.random.PRNGKey(0)
    kx, kw, kb = jax.random.split(key, 3)

    x = jax.random.normal(kx, (B, S, d_model), dtype=jnp.float32)
    # Deterministic synthetic parameters in native nn.Linear layout.
    weight = jax.random.normal(kw, (d_proj, d_model), dtype=jnp.float32) * 0.02
    bias = jax.random.normal(kb, (d_proj,), dtype=jnp.float32) * 0.02

    # One-time weight transpose at parameter-load time.
    w_kn = jax.block_until_ready(prepare_weight(weight))

    # --- f32 path (single-K fast path, no scratch) ---
    out = jax.block_until_ready(projection(x, w_kn, bias))
    ref = x @ weight.T + bias
    assert out.shape == (B, S, d_proj)
    assert jnp.allclose(out, ref, atol=1e-3, rtol=1e-3)

    # --- multi-K path with masked K tail (d_model=768, tk=512 -> tail=256) ---
    out_mk = jax.block_until_ready(projection(x, w_kn, bias, tk_max=512))
    assert jnp.allclose(out_mk, ref, atol=1e-3, rtol=1e-3)

    # --- bf16 operands (native MXU dtype, f32 accumulate, bf16 output) ---
    x_bf = x.astype(jnp.bfloat16)
    w_bf = w_kn.astype(jnp.bfloat16)
    out_bf = jax.block_until_ready(projection(x_bf, w_bf, bias))
    ref_bf = (x_bf.astype(jnp.float32) @ w_bf.astype(jnp.float32) + bias)
    assert jnp.allclose(out_bf.astype(jnp.float32), ref_bf, atol=2e-2, rtol=2e-2)

    print("KERNEL_OK")
</pallas_src>

<mosaic_0001>
module attributes {stable_mosaic.version = 11 : i64} {
  func.func @_proj_kernel_single_k(%arg0: i32, %arg1: i32, %arg2: i32, %arg3: memref<16x768xf32, #tpu.memory_space<vmem>>, %arg4: memref<768x128xf32, #tpu.memory_space<vmem>>, %arg5: memref<1x128xf32, #tpu.memory_space<vmem>>, %arg6: memref<16x128xf32, #tpu.memory_space<vmem>>) attributes {dimension_semantics = [#tpu.dimension_semantics<parallel>, #tpu.dimension_semantics<parallel>, #tpu.dimension_semantics<arbitrary>], iteration_bounds = array<i64: 1, 2, 1>, scalar_prefetch = 0 : i64, scratch_operands = 0 : i64, tpu.core_type = #tpu.core_type<tc>, window_params = [{transform_indices = @transform_0, window_bounds = array<i64: 16, 768>}, {transform_indices = @transform_1, window_bounds = array<i64: 768, 128>}, {transform_indices = @transform_2, window_bounds = array<i64: 1, 128>}, {transform_indices = @transform_3, window_bounds = array<i64: 16, 128>}]} {
    %c0 = arith.constant 0 : index
    %c0_0 = arith.constant 0 : index
    %0 = vector.load %arg3[%c0, %c0_0] : memref<16x768xf32, #tpu.memory_space<vmem>>, vector<16x768xf32>
    %c0_1 = arith.constant 0 : index
    %c0_2 = arith.constant 0 : index
    %1 = vector.load %arg4[%c0_1, %c0_2] : memref<768x128xf32, #tpu.memory_space<vmem>>, vector<768x128xf32>
    %cst = arith.constant dense<0.000000e+00> : vector<16x128xf32>
    %2 = tpu.matmul %0, %1, %cst {dimension_numbers = #tpu.dot_dimension_numbers<[1], [0], [0], [1], [0, 0, 1, 1], [], []>} : vector<16x768xf32>, vector<768x128xf32>, vector<16x128xf32> -> vector<16x128xf32>
    %c0_3 = arith.constant 0 : index
    %c0_4 = arith.constant 0 : index
    %3 = vector.load %arg5[%c0_3, %c0_4] : memref<1x128xf32, #tpu.memory_space<vmem>>, vector<1x128xf32>
    %4 = vector.broadcast %3 : vector<1x128xf32> to vector<16x128xf32>
    %5 = arith.addf %2, %4 : vector<16x128xf32>
    %c0_5 = arith.constant 0 : index
    %c0_6 = arith.constant 0 : index
    %6 = vector.load %arg6[%c0_5, %c0_6] : memref<16x128xf32, #tpu.memory_space<vmem>>, vector<16x128xf32>
    tpu.vector_store %arg6[%c0_5, %c0_6], %5 {strides = array<i32>} : memref<16x128xf32, #tpu.memory_space<vmem>>, vector<16x128xf32>,
    return
  }
  func.func @transform_0(%arg0: i32, %arg1: i32, %arg2: i32) -> (i32, i32) {
    %c0_i32 = arith.constant 0 : i32
    return %arg0, %arg2 : i32, i32
  }
  func.func @transform_1(%arg0: i32, %arg1: i32, %arg2: i32) -> (i32, i32) {
    %c0_i32 = arith.constant 0 : i32
    return %arg2, %arg1 : i32, i32
  }
  func.func @transform_2(%arg0: i32, %arg1: i32, %arg2: i32) -> (i32, i32) {
    %c0_i32 = arith.constant 0 : i32
    %c0_i32_0 = arith.constant 0 : i32
    return %c0_i32, %arg1 : i32, i32
  }
  func.func @transform_3(%arg0: i32, %arg1: i32, %arg2: i32) -> (i32, i32) {
    %c0_i32 = arith.constant 0 : i32
    return %arg0, %arg1 : i32, i32
  }
}

</mosaic_0001>

<bundles_post_ra>
// kernel: tpu_custom_call.1
= control target key start
LH: loop header
LB: loop body
LE: loop exit
PB: predicated region body
PF: predicated region fallthrough
CT: control target
= control target key end

     0   :  { %8 = vsyncpa [#allocation3], 0  ;;  %s1280_s0 = inlined_call_operand.hbm [shape: f32[16,768], index: 0, kind: input, shape index: {}]   ;;  %s1281_s1 = inlined_call_operand.hbm [shape: f32[768,256], index: 1, kind: input, shape index: {}]   ;;  %s1282_s2 = inlined_call_operand.hbm [shape: f32[1,256], index: 2, kind: input, shape index: {}]   ;;  %s1283_s3 = inlined_call_operand.hbm [shape: f32[16,256], index: 3, kind: output, shape index: {}]  }
   0x1   :  { %9 = vsyncpa [#allocation6], 0 }
   0x2   :  { %11 = vsyncpa [#allocation6 + $0x1], 0 }
   0x3   :  { %12 = vsyncpa [#allocation4], 0 }
   0x4   :  { %14 = vsyncpa [#allocation4 + $0x1], 0  ;;  %s1014_s12 = smov 0   ;;  %s1016_s13 = smov 0  }
   0x5   :  { %s1018_s14 = smov 0   ;;  %s1020_s15 = smov 0  }
   0x6   :  { %s1022_s16 = smov 0   ;;  %s1024_s17 = smov 0  }
   0x7 LB: > { %s35_s18 = sadd.s32 1, %s979_s16  ;;  %s76_s19 = sadd.s32 1, %s971_s14  ;;  %s983_s17 = sphi %s1024_s17, %s20_s17   ;;  %s979_s16 = sphi %s1022_s16, %s1293_s16   ;;  %s975_s15 = sphi %s1020_s15, %s1292_s15   ;;  %s971_s14 = sphi %s1018_s14, %s1291_s14   ;;  %s967_s13 = sphi %s1016_s13, %s1290_s13   ;;  %s963_s12 = sphi %s1014_s12, %s1289_s12  }
   0x8   : > { %p37_p0 = scmp.ge.s32.totalorder %s35_s18, 2  ;;  %p83_p1 = scmp.ne.s32.totalorder %s971_s14, %s967_s13 }
   0x9   : > { %p84_p2 = scmp.eq.s32.totalorder %s983_s17, 0  ;;  %p677_p3 = scmp.ge.s32.totalorder %s983_s17, 2 }
   0xa   : > { %s1295_s18 = smov (%p37_p0, %s35_s18), 0  ;;  %p746_p5 = scmp.lt.s32.totalorder %s983_s17, 2 }
   0xb   : > { %p85_p4 = por %p84_p2, %p83_p1  ;;  %s72_s20 = ssub.s32 %s979_s16, %s1295_s18 }
   0xc   : > { %s187_s21 = sand.u32 1, %s983_s17   ;;  %p74_p6 = scmp.eq.s32.totalorder %s72_s20, 0 }
   0xd   : > { %s189_s22 = sand.u32 1, %s971_s14   ;;  %s678_s23 = sshll.u32 %s979_s16, 3 }
   0xe   : > { %s1062_s24 = scalar_select %p74_p6, %s971_s14, %s76_s19  }
   0xf   : > { %s718_s25 = smul.u32 768, %s189_s22  ;;  %s198_s28 = scalar_lea.hbm %s1281_s1, %s678_s23 }
  0x10   : > { %s199_s29 = sshll.u32 %s198_s28, 4  ;;  %p1069_p7 = pnand %p746_p5, %p85_p4  ;;  %s200_s29 = int_to_ptr.hbm [resolvable:$true] %s199_s29 }
  0x11   : > { %s191_s4 = scalar_lea.vmem [#allocation5], %s718_s25  ;;  %s1073_s6 = scalar_lea.sflag [#allocation6], %s187_s21 }
  0x12   : > { %s201_s5 = sshll.u32 %s191_s4, 4  ;;  %s985_s7 = smov 256   ;;  %s202_s5 = int_to_ptr.vmem [resolvable:$true] %s201_s5 }
  0x13   : > { %s986_s8 = smov 128   ;;  %s987_s9 = smov 8  }
  0x14   : > { %737 = dma.hbm_to_vmem [thread:$0]  (!%p1069_p7), %s200_s29, 12288, %s202_s5, %s1073_s6, %s985_s7, %s986_s8, %s987_s9  }
  0x15   : > { %s1079_s10 = sadd.s32 4294967295, %s983_s17   ;;  %s674_s11 = sadd.s32 4294967294, %s983_s17  }
  0x16   : > { %p89_p8 = scmp.ne.s32.totalorder %s967_s13, %s963_s12  ;;  %p90_p9 = scmp.eq.s32.totalorder %s1079_s10, 0 }
  0x17   : > { %p141_p10 = scmp.eq.s32.totalorder %s1079_s10, 1  ;;  %p147_p11 = scmp.eq.s32.totalorder %s674_s11, 1 }
  0x18   : > { %p1088_p12 = por %p90_p9, %p89_p8  ;;  %p675_p13 = scmp.ge.s32.totalorder %s983_s17, 1 }
  0x19   : > { %p1096_p0 = por %p141_p10, %p83_p1  ;;  %p1100_p2 = por %p147_p11, %p89_p8 }
  0x1a   : > { %p154_p4 = scmp.lt.s32.totalorder %s983_s17, 3  ;;  %s171_s26 = sshll.u32 %s1280_s0, 4  ;;  %s172_s26 = int_to_ptr.hbm [resolvable:$true] %s171_s26 }
  0x1b   : > { %s988_s28 = smov [#allocation2]   ;;  %s217_s7 = scalar_lea.hbm %s1282_s2, %s979_s16 }
  0x1c   : > { %p1108_p5 = pnand %p675_p13, %p154_p4  ;;  %s173_s29 = sshll.u32 %s988_s28, 4  ;;  %s174_s29 = int_to_ptr.vmem [resolvable:$true] %s173_s29 }
  0x1d   : > { %s219_s8 = sshll.u32 %s217_s7, 4  ;;  %s214_s9 = scalar_lea.vmem [#allocation7], %s189_s22  ;;  %s220_s8 = int_to_ptr.hbm [resolvable:$true] %s219_s8 }
  0x1e   : > { %p730_p1 = pneg %p1108_p5  ;;  %s221_s11 = sshll.u32 %s214_s9, 4  ;;  %s222_s11 = int_to_ptr.vmem [resolvable:$true] %s221_s11 }
  0x1f   : > { %s989_s23 = smov 768   ;;  %s990_s25 = smov 48  }
  0x20   : > { %p731_p6 = pnand %p730_p1, %p90_p9  ;;  %230 = sbr.rel (%p1108_p5) target bundleno = 253 (0xfd), region = 32 }
  0x21   : > { %740 = dma.hbm_to_vmem [thread:$0]  (!%p1069_p7), %s220_s8, 16, %s222_s11, %s1073_s6  }
  0x22   : > { %733 = dma.hbm_to_vmem [thread:$0]  (!%p731_p6), %s172_s26, 1536, %s174_s29, [#allocation3], %s989_s23, %s989_s23, %s990_s25  }
  0x25   : > { %950 = dma.done.wait (%p90_p9), [#allocation3], 1536  }
  0x26   : > { %952 = vsyncadd (%p90_p9), [#allocation3], 4294965760  ;;  %s237_s22 = sand.u32 1, %s1079_s10   ;;  %s1133_s28 = sand.u32 1, %s967_s13  }
  0x27   : > { %s719_s26 = smul.u32 768, %s1133_s28  ;;  %s238_s29 = scalar_lea.sflag [#allocation6], %s237_s22 }
  0x29   : > { %s1136_s30 = scalar_lea.vmem [#allocation5], %s719_s26 }
  0x2a   : > { %954 = dma.done.wait (%p1088_p12), %s238_s29, 12304  }
  0x2b   : > { %956 = vsyncadd (%p1088_p12), %s238_s29, 4294954992  ;;  %v309_v0 = vld [vmem:[%s1136_s30 + $0x78] sm:$0xff]  ;;  %v308_v2 = vld [vmem:[%s1136_s30 + $0x70] sm:$0xff]  ;;  %s250_s6 = scalar_lea.vmem [#allocation7], %s1133_s28  ;;  %s681_s10 = sshll.u32 %s1133_s28, 4 }
  0x2c   : > { %v341_v1 = vld [vmem:[%s1136_s30 + $0x178] sm:$0xff]  ;;  %394 = vmatpush.msra.mxu0 %v309_v0  ;;  %v340_v4 = vld [vmem:[%s1136_s30 + $0x170] sm:$0xff]  ;;  %v307_v6 = vld [vmem:[%s1136_s30 + $0x68] sm:$0xff]  ;;  %s683_s19 = sshll.u32 %s975_s15, 3  ;;  %s277_s7 = scalar_lea.vmem [#allocation8], %s681_s10 }
  0x2d   : > { %440 = vmatpush.msra.mxu2 %v341_v1  ;;  %v325_v3 = vld [vmem:[%s1136_s30 + $0xf8] sm:$0xff]  ;;  %v324_v7 = vld [vmem:[%s1136_s30 + $0xf0] sm:$0xff]  ;;  %v339_v8 = vld [vmem:[%s1136_s30 + $0x168] sm:$0xff]  ;;  %s548_s5 = scalar_lea.hbm %s1283_s3, %s683_s19  ;;  %s549_s8 = sshll.u32 %s277_s7, 4  ;;  %s550_s8 = int_to_ptr.vmem [resolvable:$true] %s549_s8 }
  0x2e   : > { %v357_v5 = vld [vmem:[%s1136_s30 + $0x1f8] sm:$0xff]  ;;  %417 = vmatpush.msra.mxu1 %v325_v3  ;;  %395 = vmatpush.msra.mxu0 %v308_v2  ;;  %v356_v9 = vld [vmem:[%s1136_s30 + $0x1f0] sm:$0xff]  ;;  %v323_v10 = vld [vmem:[%s1136_s30 + $0xe8] sm:$0xff]  ;;  %s551_s9 = sshll.u32 %s548_s5, 4  ;;  %s535_s15 = scalar_lea.sflag [#allocation4], %s1133_s28  ;;  %s552_s9 = int_to_ptr.hbm [resolvable:$true] %s551_s9 }
  0x2f   : > { %463 = vmatpush.msra.mxu3 %v357_v5  ;;  %441 = vmatpush.msra.mxu2 %v340_v4  ;;  %v306_v11 = vld [vmem:[%s1136_s30 + $0x60] sm:$0xff]  ;;  %v355_v13 = vld [vmem:[%s1136_s30 + $0x1e8] sm:$0xff]  ;;  %v305_v16 = vld [vmem:[%s1136_s30 + $0x58] sm:$0xff]  ;;  %s911_s11 = sshra.s32 %s552_s9, 4  ;;  %s917_s26 = scalar_lea.hbm %s1283_s3, 32  ;;  %s912_s11 = int_to_ptr.hbm [resolvable:$true] %s911_s11 }
  0x30   : > { %418 = vmatpush.msra.mxu1 %v324_v7  ;;  %v338_v12 = vld [vmem:[%s1136_s30 + $0x160] sm:$0xff]  ;;  %396 = vmatpush.msra.mxu0 %v307_v6  ;;  %v337_v17 = vld [vmem:[%s1136_s30 + $0x158] sm:$0xff]  ;;  %v304_v20 = vld [vmem:[%s1136_s30 + $0x50] sm:$0xff]  ;;  %s913_s23 = scalar_lea.hbm %s912_s11, 16  ;;  %p918_p10 = scmp.lt.s32.totalorder %s912_s11, %s1283_s3 }
  0x31   : > { %464 = vmatpush.msra.mxu3 %v356_v9  ;;  %442 = vmatpush.msra.mxu2 %v339_v8  ;;  %v322_v14 = vld [vmem:[%s1136_s30 + $0xe0] sm:$0xff]  ;;  %v321_v18 = vld [vmem:[%s1136_s30 + $0xd8] sm:$0xff]  ;;  %v336_v21 = vld [vmem:[%s1136_s30 + $0x150] sm:$0xff]  ;;  %p914_p7 = scmp.ne.s32.totalorder %s912_s11, %s913_s23  ;;  %p919_p11 = scmp.lt.s32.totalorder %s917_s26, %s913_s23 }
  0x32   : > { %v354_v15 = vld [vmem:[%s1136_s30 + $0x1e0] sm:$0xff]  ;;  %419 = vmatpush.msra.mxu1 %v323_v10  ;;  %397 = vmatpush.msra.mxu0 %v306_v11  ;;  %v353_v19 = vld [vmem:[%s1136_s30 + $0x1d8] sm:$0xff]  ;;  %v320_v22 = vld [vmem:[%s1136_s30 + $0xd0] sm:$0xff] }
  0x33   : > { %465 = vmatpush.msra.mxu3 %v355_v13  ;;  %443 = vmatpush.msra.mxu2 %v338_v12  ;;  %v352_v23 = vld [vmem:[%s1136_s30 + $0x1d0] sm:$0xff]  ;;  %v303_v24 = vld [vmem:[%s1136_s30 + $0x48] sm:$0xff]  ;;  %v302_v28 = vld [vmem:[%s1136_s30 + $0x40] sm:$0xff]  ;;  %p915_p8 = pnand %p914_p7, %p1096_p0  ;;  %p920_p12 = por %p919_p11, %p918_p10 }
  0x34   : > { %420 = vmatpush.msra.mxu1 %v322_v14  ;;  %398 = vmatpush.msra.mxu0 %v305_v16  ;;  %v335_v25 = vld [vmem:[%s1136_s30 + $0x148] sm:$0xff]  ;;  %v334_v29 = vld [vmem:[%s1136_s30 + $0x140] sm:$0xff]  ;;  %v301_v32 = vld [vmem:[%s1136_s30 + $0x38] sm:$0xff] }
  0x35   : > { %466 = vmatpush.msra.mxu3 %v354_v15  ;;  %444 = vmatpush.msra.mxu2 %v337_v17  ;;  %v319_v26 = vld [vmem:[%s1136_s30 + $0xc8] sm:$0xff]  ;;  %v318_v30 = vld [vmem:[%s1136_s30 + $0xc0] sm:$0xff]  ;;  %v333_v33 = vld [vmem:[%s1136_s30 + $0x138] sm:$0xff]  ;;  %p916_p9 = pneg %p915_p8 }
  0x36   : > { %421 = vmatpush.msra.mxu1 %v321_v18  ;;  %399 = vmatpush.msra.mxu0 %v304_v20  ;;  %v351_v27 = vld [vmem:[%s1136_s30 + $0x1c8] sm:$0xff]  ;;  %v350_v31 = vld [vmem:[%s1136_s30 + $0x1c0] sm:$0xff]  ;;  %v317_v34 = vld [vmem:[%s1136_s30 + $0xb8] sm:$0xff] }
  0x37   : > { %467 = vmatpush.msra.mxu3 %v353_v19  ;;  %445 = vmatpush.msra.mxu2 %v336_v21  ;;  %v349_v35 = vld [vmem:[%s1136_s30 + $0x1b8] sm:$0xff]  ;;  %v300_v36 = vld [vmem:[%s1136_s30 + $0x30] sm:$0xff]  ;;  %v299_v40 = vld [vmem:[%s1136_s30 + $0x28] sm:$0xff]  ;;  %p921_p13 = pnand %p920_p12, %p916_p9 }
  0x38   : > { %422 = vmatpush.msra.mxu1 %v320_v22  ;;  %400 = vmatpush.msra.mxu0 %v303_v24  ;;  %v332_v37 = vld [vmem:[%s1136_s30 + $0x130] sm:$0xff]  ;;  %v331_v41 = vld [vmem:[%s1136_s30 + $0x128] sm:$0xff]  ;;  %v298_v44 = vld [vmem:[%s1136_s30 + $0x20] sm:$0xff] }
  0x39   : > { %468 = vmatpush.msra.mxu3 %v352_v23  ;;  %446 = vmatpush.msra.mxu2 %v335_v25  ;;  %v316_v38 = vld [vmem:[%s1136_s30 + $0xb0] sm:$0xff]  ;;  %v315_v42 = vld [vmem:[%s1136_s30 + $0xa8] sm:$0xff]  ;;  %v330_v45 = vld [vmem:[%s1136_s30 + $0x120] sm:$0xff] }
  0x3a   : > { %423 = vmatpush.msra.mxu1 %v319_v26  ;;  %401 = vmatpush.msra.mxu0 %v302_v28  ;;  %v348_v39 = vld [vmem:[%s1136_s30 + $0x1b0] sm:$0xff]  ;;  %v347_v43 = vld [vmem:[%s1136_s30 + $0x1a8] sm:$0xff]  ;;  %v314_v46 = vld [vmem:[%s1136_s30 + $0xa0] sm:$0xff] }
  0x3b   : > { %469 = vmatpush.msra.mxu3 %v351_v27  ;;  %447 = vmatpush.msra.mxu2 %v334_v29  ;;  %v346_v47 = vld [vmem:[%s1136_s30 + $0x1a0] sm:$0xff]  ;;  %v297_v48 = vld [vmem:[%s1136_s30 + $0x18] sm:$0xff]  ;;  %v296_v52 = vld [vmem:[%s1136_s30 + $0x10] sm:$0xff] }
  0x3c   : > { %424 = vmatpush.msra.mxu1 %v318_v30  ;;  %402 = vmatpush.msra.mxu0 %v301_v32  ;;  %v329_v49 = vld [vmem:[%s1136_s30 + $0x118] sm:$0xff]  ;;  %v328_v53 = vld [vmem:[%s1136_s30 + $0x110] sm:$0xff]  ;;  %v295_v56 = vld [vmem:[%s1136_s30 + $0x8] sm:$0xff] }
  0x3d   : > { %470 = vmatpush.msra.mxu3 %v350_v31  ;;  %448 = vmatpush.msra.mxu2 %v333_v33  ;;  %v313_v50 = vld [vmem:[%s1136_s30 + $0x98] sm:$0xff]  ;;  %v312_v54 = vld [vmem:[%s1136_s30 + $0x90] sm:$0xff]  ;;  %v327_v57 = vld [vmem:[%s1136_s30 + $0x108] sm:$0xff] }
  0x3e   : > { %425 = vmatpush.msra.mxu1 %v317_v34  ;;  %403 = vmatpush.msra.mxu0 %v300_v36  ;;  %v345_v51 = vld [vmem:[%s1136_s30 + $0x198] sm:$0xff]  ;;  %v344_v55 = vld [vmem:[%s1136_s30 + $0x190] sm:$0xff]  ;;  %v311_v58 = vld [vmem:[%s1136_s30 + $0x88] sm:$0xff] }
  0x3f   : > { %471 = vmatpush.msra.mxu3 %v349_v35  ;;  %449 = vmatpush.msra.mxu2 %v332_v37  ;;  %v343_v59 = vld [vmem:[%s1136_s30 + $0x188] sm:$0xff]  ;;  %v294_v60 = vld [vmem:[%s1136_s30] sm:$0xff]  ;;  %v373_v62 = vld [vmem:[%s1136_s30 + $0x278] sm:$0xff] }
  0x40   : > { %426 = vmatpush.msra.mxu1 %v316_v38  ;;  %404 = vmatpush.msra.mxu0 %v299_v40  ;;  %v326_v61 = vld [vmem:[%s1136_s30 + $0x100] sm:$0xff]  ;;  %v372_v1 = vld [vmem:[%s1136_s30 + $0x270] sm:$0xff]  ;;  %v389_v2 = vld [vmem:[%s1136_s30 + $0x2f8] sm:$0xff] }
  0x41   : > { %472 = vmatpush.msra.mxu3 %v348_v39  ;;  %450 = vmatpush.msra.mxu2 %v331_v41  ;;  %v310_v63 = vld [vmem:[%s1136_s30 + $0x80] sm:$0xff]  ;;  %v371_v3 = vld [vmem:[%s1136_s30 + $0x268] sm:$0xff]  ;;  %v388_v4 = vld [vmem:[%s1136_s30 + $0x2f0] sm:$0xff] }
  0x42   : > { %427 = vmatpush.msra.mxu1 %v315_v42  ;;  %405 = vmatpush.msra.mxu0 %v298_v44  ;;  %v342_v0 = vld [vmem:[%s1136_s30 + $0x180] sm:$0xff]  ;;  %v387_v6 = vld [vmem:[%s1136_s30 + $0x2e8] sm:$0xff]  ;;  %v369_v7 = vld [vmem:[%s1136_s30 + $0x258] sm:$0xff] }
  0x43   : > { %473 = vmatpush.msra.mxu3 %v347_v43  ;;  %451 = vmatpush.msra.mxu2 %v330_v45  ;;  %v370_v5 = vld [vmem:[%s1136_s30 + $0x260] sm:$0xff]  ;;  %v368_v9 = vld [vmem:[%s1136_s30 + $0x250] sm:$0xff]  ;;  %v385_v10 = vld [vmem:[%s1136_s30 + $0x2d8] sm:$0xff] }
  0x44   : > { %428 = vmatpush.msra.mxu1 %v314_v46  ;;  %406 = vmatpush.msra.mxu0 %v297_v48  ;;  %v386_v8 = vld [vmem:[%s1136_s30 + $0x2e0] sm:$0xff]  ;;  %v367_v11 = vld [vmem:[%s1136_s30 + $0x248] sm:$0xff]  ;;  %v384_v12 = vld [vmem:[%s1136_s30 + $0x2d0] sm:$0xff] }
  0x45   : > { %474 = vmatpush.msra.mxu3 %v346_v47  ;;  %452 = vmatpush.msra.mxu2 %v329_v49  ;;  %v366_v13 = vld [vmem:[%s1136_s30 + $0x240] sm:$0xff]  ;;  %v383_v14 = vld [vmem:[%s1136_s30 + $0x2c8] sm:$0xff]  ;;  %v284_v16 = vld [vmem:[#allocation2 + $0x10] sm:$0xff] }
  0x46   : > { %429 = vmatpush.msra.mxu1 %v313_v50  ;;  %407 = vmatpush.msra.mxu0 %v296_v52  ;;  %v282_v15 = vld [vmem:[#allocation2] sm:$0xff]  ;;  %v365_v17 = vld [vmem:[%s1136_s30 + $0x238] sm:$0xff]  ;;  %v283_v19 = vld [vmem:[#allocation2 + $0x8] sm:$0xff] }
  0x47   : > { %475 = vmatpush.msra.mxu3 %v345_v51  ;;  %453 = vmatpush.msra.mxu2 %v328_v53  ;;  %v382_v18 = vld [vmem:[%s1136_s30 + $0x2c0] sm:$0xff]  ;;  %v285_v20 = vld [vmem:[#allocation2 + $0x18] sm:$0xff]  ;;  %v364_v21 = vld [vmem:[%s1136_s30 + $0x230] sm:$0xff] }
  0x48   : > { %430 = vmatpush.msra.mxu1 %v312_v54  ;;  %408 = vmatpush.msra.mxu0 %v295_v56  ;;  %v381_v22 = vld [vmem:[%s1136_s30 + $0x2b8] sm:$0xff]  ;;  %v363_v23 = vld [vmem:[%s1136_s30 + $0x228] sm:$0xff]  ;;  %v380_v24 = vld [vmem:[%s1136_s30 + $0x2b0] sm:$0xff] }
  0x49   : > { %476 = vmatpush.msra.mxu3 %v344_v55  ;;  %454 = vmatpush.msra.mxu2 %v327_v57  ;;  %v362_v25 = vld [vmem:[%s1136_s30 + $0x220] sm:$0xff]  ;;  %v379_v26 = vld [vmem:[%s1136_s30 + $0x2a8] sm:$0xff]  ;;  %v288_v27 = vld [vmem:[#allocation2 + $0x30] sm:$0xff] }
  0x4a   : > { %431 = vmatpush.msra.mxu1 %v311_v58  ;;  %409 = vmatpush.msra.mxu0 %v294_v60  ;;  %v290_v28 = vld [vmem:[#allocation2 + $0x40] sm:$0xff]  ;;  %v361_v29 = vld [vmem:[%s1136_s30 + $0x218] sm:$0xff]  ;;  %v291_v32 = vld [vmem:[#allocation2 + $0x48] sm:$0xff] }
  0x4b   : > { %477 = vmatpush.msra.mxu3 %v343_v59  ;;  %455 = vmatpush.msra.mxu2 %v326_v61  ;;  %v378_v30 = vld [vmem:[%s1136_s30 + $0x2a0] sm:$0xff]  ;;  %v289_v31 = vld [vmem:[#allocation2 + $0x38] sm:$0xff]  ;;  %v360_v33 = vld [vmem:[%s1136_s30 + $0x210] sm:$0xff] }
  0x4c   : > { %486 = vmatpush.msrb.mxu0 %v373_v62  ;;  %432 = vmatpush.msra.mxu1 %v310_v63  ;;  %v377_v34 = vld [vmem:[%s1136_s30 + $0x298] sm:$0xff]  ;;  %v359_v35 = vld [vmem:[%s1136_s30 + $0x208] sm:$0xff]  ;;  %v376_v36 = vld [vmem:[%s1136_s30 + $0x290] sm:$0xff] }
  0x4d   : > { %686 = vmatpush.msrb.mxu2 %v373_v62  ;;  %478 = vmatpush.msra.mxu3 %v342_v0  ;;  %v358_v37 = vld [vmem:[%s1136_s30 + $0x200] sm:$0xff]  ;;  %v375_v38 = vld [vmem:[%s1136_s30 + $0x288] sm:$0xff]  ;;  %v292_v40 = vld [vmem:[#allocation2 + $0x50] sm:$0xff] }
  0x4e   : > { %487 = vmatpush.msrb.mxu0 %v372_v1  ;;  %509 = vmatpush.msrb.mxu1 %v389_v2  ;;  %v286_v39 = vld [vmem:[#allocation2 + $0x20] sm:$0xff]  ;;  %v287_v42 = vld [vmem:[#allocation2 + $0x28] sm:$0xff]  ;;  %v293_v43 = vld [vmem:[#allocation2 + $0x58] sm:$0xff] }
  0x4f   : > { %687 = vmatpush.msrb.mxu2 %v372_v1  ;;  %702 = vmatpush.msrb.mxu3 %v389_v2  ;;  %v374_v41 = vld [vmem:[%s1136_s30 + $0x280] sm:$0xff] }
  0x50   : > { %488 = vmatpush.msrb.mxu0 %v371_v3  ;;  %510 = vmatpush.msrb.mxu1 %v388_v4  ;;  %v806_v45 = vld [vmem:[%s250_s6] ss:$0 sm:$0xff] }
  0x51   : > { %688 = vmatpush.msrb.mxu2 %v371_v3  ;;  %703 = vmatpush.msrb.mxu3 %v388_v4 }
  0x52   : > { %489 = vmatpush.msrb.mxu0 %v370_v5  ;;  %511 = vmatpush.msrb.mxu1 %v387_v6 }
  0x53   : > { %689 = vmatpush.msrb.mxu2 %v370_v5  ;;  %704 = vmatpush.msrb.mxu3 %v387_v6 }
  0x54   : > { %490 = vmatpush.msrb.mxu0 %v369_v7  ;;  %512 = vmatpush.msrb.mxu1 %v386_v8 }
  0x55   : > { %690 = vmatpush.msrb.mxu2 %v369_v7  ;;  %705 = vmatpush.msrb.mxu3 %v386_v8 }
  0x56   : > { %491 = vmatpush.msrb.mxu0 %v368_v9  ;;  %513 = vmatpush.msrb.mxu1 %v385_v10 }
  0x57   : > { %691 = vmatpush.msrb.mxu2 %v368_v9  ;;  %706 = vmatpush.msrb.mxu3 %v385_v10 }
  0x58   : > { %492 = vmatpush.msrb.mxu0 %v367_v11  ;;  %514 = vmatpush.msrb.mxu1 %v384_v12 }
  0x59   : > { %692 = vmatpush.msrb.mxu2 %v367_v11  ;;  %707 = vmatpush.msrb.mxu3 %v384_v12 }
  0x5a   : > { %493 = vmatpush.msrb.mxu0 %v366_v13  ;;  %515 = vmatpush.msrb.mxu1 %v383_v14 }
  0x5b   : > { %693 = vmatpush.msrb.mxu2 %v366_v13  ;;  %708 = vmatpush.msrb.mxu3 %v383_v14 }
  0x5c   : > { %410 = vmatmul.f32.vlgmr.msra.gmra.mxu0 %v282_v15  ;;  %456 = vmatmul.f32.vlgmr.msra.gmra.mxu2 %v284_v16 }
  0x5d   : > { %494 = vmatpush.msrb.mxu0 %v365_v17  ;;  %694 = vmatpush.msrb.mxu2 %v365_v17 }
  0x5e   : > { %516 = vmatpush.msrb.mxu1 %v382_v18  ;;  %709 = vmatpush.msrb.mxu3 %v382_v18 }
  0x5f   : > { %433 = vmatmul.f32.vlgmr.msra.gmra.mxu1 %v283_v19  ;;  %479 = vmatmul.f32.vlgmr.msra.gmra.mxu3 %v285_v20 }
  0x60   : > { %495 = vmatpush.msrb.mxu0 %v364_v21  ;;  %695 = vmatpush.msrb.mxu2 %v364_v21 }
  0x61   : > { %517 = vmatpush.msrb.mxu1 %v381_v22  ;;  %710 = vmatpush.msrb.mxu3 %v381_v22 }
  0x62   : > { %496 = vmatpush.msrb.mxu0 %v363_v23  ;;  %696 = vmatpush.msrb.mxu2 %v363_v23 }
  0x63   : > { %518 = vmatpush.msrb.mxu1 %v380_v24  ;;  %711 = vmatpush.msrb.mxu3 %v380_v24 }
  0x64   : > { %497 = vmatpush.msrb.mxu0 %v362_v25  ;;  %697 = vmatpush.msrb.mxu2 %v362_v25 }
  0x65   : > { %519 = vmatpush.msrb.mxu1 %v379_v26  ;;  %712 = vmatpush.msrb.mxu3 %v379_v26 }
  0x66   : > { %413 = vmatmul.f32.gmra.mxu0 %v288_v27  ;;  %459 = vmatmul.f32.gmra.mxu2 %v290_v28 }
  0x67   : > { %498 = vmatpush.msrb.mxu0 %v361_v29  ;;  %698 = vmatpush.msrb.mxu2 %v361_v29 }
  0x68   : > { %520 = vmatpush.msrb.mxu1 %v378_v30  ;;  %713 = vmatpush.msrb.mxu3 %v378_v30 }
  0x69   : > { %436 = vmatmul.f32.gmra.mxu1 %v289_v31  ;;  %482 = vmatmul.f32.gmra.mxu3 %v291_v32 }
  0x6a   : > { %499 = vmatpush.msrb.mxu0 %v360_v33  ;;  %699 = vmatpush.msrb.mxu2 %v360_v33 }
  0x6b   : > { %521 = vmatpush.msrb.mxu1 %v377_v34  ;;  %714 = vmatpush.msrb.mxu3 %v377_v34 }
  0x6c   : > { %500 = vmatpush.msrb.mxu0 %v359_v35  ;;  %700 = vmatpush.msrb.mxu2 %v359_v35 }
  0x6d   : > { %522 = vmatpush.msrb.mxu1 %v376_v36  ;;  %715 = vmatpush.msrb.mxu3 %v376_v36 }
  0x6e   : > { %501 = vmatpush.msrb.mxu0 %v358_v37  ;;  %701 = vmatpush.msrb.mxu2 %v358_v37 }
  0x6f   : > { %523 = vmatpush.msrb.mxu1 %v375_v38  ;;  %716 = vmatpush.msrb.mxu3 %v375_v38 }
  0x70   : > { %502 = vmatmul.f32.vlgmr.msrb.gmra.mxu0 %v286_v39  ;;  %505 = vmatmul.f32.vlgmr.msrb.gmra.mxu2 %v292_v40 }
  0x71   : > { %524 = vmatpush.msrb.mxu1 %v374_v41  ;;  %717 = vmatpush.msrb.mxu3 %v374_v41 }
  0x72   : > { %525 = vmatmul.f32.vlgmr.msrb.gmra.mxu1 %v287_v42  ;;  %528 = vmatmul.f32.vlgmr.msrb.gmra.mxu3 %v293_v43 }
  0xd9   : > { %v411_v44 = vpop.f32.mrf.mxu0 }
  0xda   : > { %v412_v48 = vadd.f32 %v806_v45, %v411_v44 }
  0xdc   : > { %v434_v46 = vpop.f32.mrf.mxu1 }
  0xdd   : > { %v435_v51 = vadd.f32 %v434_v46, %v412_v48 }
  0xdf   : > { %v457_v47 = vpop.f32.mrf.mxu2 }
  0xe0   : > { %v458_v54 = vadd.f32 %v457_v47, %v435_v51 }
  0xe2   : > { %v480_v49 = vpop.f32.mrf.mxu3 }
  0xe3   : > { %v414_v50 = vpop.f32.mrf.mxu0  ;;  %v481_v57 = vadd.f32 %v480_v49, %v458_v54 }
  0xe4   : > { %v415_v52 = vadd.f32 %v806_v45, %v414_v50 }
  0xe6   : > { %v437_v53 = vpop.f32.mrf.mxu1 }
  0xe7   : > { %v438_v56 = vadd.f32 %v437_v53, %v415_v52 }
  0xe9   : > { %v460_v55 = vpop.f32.mrf.mxu2 }
  0xea   : > { %v461_v60 = vadd.f32 %v460_v55, %v438_v56 }
  0xec   : > { %v483_v58 = vpop.f32.mrf.mxu3 }
  0xed   : > { %v503_v59 = vpop.f32.mrf.mxu0  ;;  %v484_v0 = vadd.f32 %v483_v58, %v461_v60 }
  0xee   : > { %v504_v61 = vadd.f32 %v503_v59, %v481_v57 }
  0xef   : > { %v526_v62 = vpop.f32.mrf.mxu1 }
  0xf0   : > { %v527_v63 = vadd.f32 %v526_v62, %v504_v61 }
  0xf2   : > { %532 = vst [vmem:[%s277_s7] sm:$0xff] %v527_v63 }
  0xf3   : > { %v506_v1 = vpop.f32.mrf.mxu2 }
  0xf4   : > { %v507_v2 = vadd.f32 %v506_v1, %v484_v0 }
  0xf5   : > { %v529_v3 = vpop.f32.mrf.mxu3 }
  0xf6   : > { %v530_v4 = vadd.f32 %v529_v3, %v507_v2 }
  0xf8   : > { %533 = vst [vmem:[%s277_s7 + $0x8] sm:$0xff] %v530_v4 }
  0xf9   : > { %924 = shalt.err (!%p921_p13)
}
  0xfa   : > { %s991_s28 = smov 128   ;;  %s992_s6 = smov 256  }
  0xfb   : > { %s993_s10 = smov 8  }
  0xfc   : > { %728 = dma.vmem_to_hbm [thread:$0]  (%p1096_p0), %s550_s8, 256, %s552_s9, %s535_s15, %s991_s28, %s992_s6, %s993_s10  }
  0xfd PF: > { %s566_s19 = sand.u32 1, %s963_s12   ;;  %p742_p4 = pnand %p677_p3, %p1100_p2 }
  0xfe   : > { %s567_s27 = scalar_lea.sflag [#allocation4], %s566_s19 }
  0xff   : > { %p743_p5 = pneg %p742_p4 }
 0x101   : > { %958 = dma.done.wait (%p743_p5), %s567_s27, 256  }
 0x102   : > { %960 = vsyncadd (%p743_p5), %s567_s27, 4294967040  ;;  %s20_s17 = sadd.s32 1, %s983_s17   ;;  %s1289_s12 = smov %s967_s13 }
 0x103   : > { %p17_p1 = scmp.ge.s32.totalorder %s20_s17, 4   ;;  %s1290_s13 = smov %s971_s14 }
 0x104   : > { %s1291_s14 = smov %s1062_s24  ;;  %s1292_s15 = smov %s979_s16 }
 0x105   : > { %s1293_s16 = smov %s1295_s18  ;;  %19 = sbr.rel (!%p17_p1) target bundleno = 7 (0x7), region = 94 }
 0x10a   :  { %573 = vsyncpa [#allocation3], 1 }
 0x10b   :  { %575 = vsyncpa [#allocation3 + $0x1], 1 }
 0x10c   :  { %576 = vsyncpa [#allocation6], 1 }
 0x10d   :  { %578 = vsyncpa [#allocation6 + $0x1], 1 }
 0x10e   :  { %579 = vsyncpa [#allocation4], 1 }
 0x10f   :  { %581 = vsyncpa [#allocation4 + $0x1], 1 }

</bundles_post_ra>
